<compile_context>
chip_gen: v6e
topology: v6e:2x2x1
jax: 0.10.0
libtpu: 0.0.40
codegen_flags: <defaults>
</compile_context>

<pallas_src>
import functools

import jax
import jax.numpy as jnp
from jax.experimental import pallas as pl
from jax.experimental.pallas import tpu as pltpu

FEATURES_DIM = 512
H1 = 256      # encoder hidden
H2 = 128      # latent
H3 = 256      # decoder hidden
OUT = 512     # decoder output


def _ae_kernel(x_ref,
               w1_ref, b1_ref,
               w23_ref, b23_ref,
               w4_ref, b4_ref,
               out_ref):
    """Fused MLP autoencoder forward for one batch tile (all weights in VMEM)."""
    # x arrives f32 straight from HBM; cast in-register (VPU) -> no extra HBM pass.
    x = x_ref[...].astype(jnp.bfloat16)                                  # (bm, 512)

    # encoder layer 1: Linear -> ReLU
    h = jnp.dot(x, w1_ref[...], preferred_element_type=jnp.float32) + b1_ref[...]
    h = jnp.maximum(h, 0.0).astype(jnp.bfloat16)                         # (bm, 256)

    # fused latent pair: Linear(256,128) -> Linear(128,256) (no activation
    # in between) == one Linear(256,256) with W23 = w2 @ w3, b23 = b2 @ w3 + b3.
    d = jnp.dot(h, w23_ref[...], preferred_element_type=jnp.float32) + b23_ref[...]
    d = jnp.maximum(d, 0.0).astype(jnp.bfloat16)                         # (bm, 256)

    # decoder output layer: Linear -> Sigmoid
    logits = jnp.dot(d, w4_ref[...], preferred_element_type=jnp.float32) + b4_ref[...]

    # sigmoid via EUP (exp + approx reciprocal); approx error << bf16 quantization.
    out_ref[...] = pl.reciprocal(1.0 + jnp.exp(-logits), approx=True).astype(out_ref.dtype)


def _round_up(x, m):
    return ((x + m - 1) // m) * m


def _choose_block_b(batch, cap=1024):
    """Pick a batch tile: >= 4 grid tiles when possible (v7x megacore + ragged-tail
    load balance), multiple of 8 (sublane constraint), capped for v5e's 16 MiB
    scoped-VMEM default."""
    tgt = _round_up(max(1, -(-batch // 4)), 8)
    return int(max(8, min(cap, tgt)))


@functools.partial(jax.jit, static_argnames=("block_b", "out_dtype", "vmem_limit_bytes"))
def autoencoder_forward(x, kparams, block_b, out_dtype=jnp.bfloat16, vmem_limit_bytes=None):
    """x: (B, FEATURES_DIM) float32.  kparams: output of prepare_kernel_params."""
    B, F = x.shape
    assert F == FEATURES_DIM

    grid_b = pl.cdiv(B, block_b)   # ragged last tile handled by masked stores

    w1, b1 = kparams["w1"], kparams["b1"]
    w23, b23 = kparams["w23"], kparams["b23"]
    w4, b4 = kparams["w4"], kparams["b4"]

    # Constant index_map -> same block every step -> Pallas skips re-DMA of weights.
    full = lambda shape: pl.BlockSpec(shape, lambda i: (0, 0))

    compiler_kwargs = dict(dimension_semantics=("parallel",))
    if vmem_limit_bytes is not None:
        compiler_kwargs["vmem_limit_bytes"] = vmem_limit_bytes

    return pl.pallas_call(
        _ae_kernel,
        out_shape=jax.ShapeDtypeStruct((B, OUT), out_dtype),
        grid_spec=pltpu.PrefetchScalarGridSpec(
            num_scalar_prefetch=0,
            grid=(grid_b,),
            in_specs=[
                pl.BlockSpec((block_b, F), lambda i: (i, 0)),   # x tile (f32)
                full(w1.shape), full(b1.shape),
                full(w23.shape), full(b23.shape),
                full(w4.shape), full(b4.shape),
            ],
            out_specs=pl.BlockSpec((block_b, OUT), lambda i: (i, 0)),
        ),
        compiler_params=pltpu.CompilerParams(**compiler_kwargs),
    )(x, w1, b1, w23, b23, w4, b4)


def autoencoder_apply(x, kparams, *, out_dtype=jnp.bfloat16, block_b=None,
                      vmem_limit_bytes=None):
    """Convenience wrapper that auto-selects the batch tile size."""
    if block_b is None:
        block_b = _choose_block_b(x.shape[0])
    return autoencoder_forward(x, kparams, block_b=block_b, out_dtype=out_dtype,
                               vmem_limit_bytes=vmem_limit_bytes)


def init_params(key):
    """Deterministic init mimicking PyTorch Linear default (U[-1/sqrt(fan_in), ...]).

    Weights are stored transposed relative to PyTorch: shape (in, out); biases (1, out).
    """
    dims = [
        ("w1", "b1", FEATURES_DIM, H1),
        ("w2", "b2", H1, H2),
        ("w3", "b3", H2, H3),
        ("w4", "b4", H3, OUT),
    ]
    params = {}
    keys = jax.random.split(key, 2 * len(dims))
    for idx, (wn, bn, fan_in, fan_out) in enumerate(dims):
        bound = 1.0 / (fan_in ** 0.5)
        params[wn] = jax.random.uniform(
            keys[2 * idx], (fan_in, fan_out), jnp.float32, -bound, bound)
        params[bn] = jax.random.uniform(
            keys[2 * idx + 1], (1, fan_out), jnp.float32, -bound, bound)
    return params


def prepare_kernel_params(params):
    """One-time param prep: fuse the latent matmul pair (in f32, quantize once)
    and cast weights to bf16; biases stay f32."""
    bf = jnp.bfloat16
    w23 = params["w2"] @ params["w3"]                       # (256, 256) f32
    b23 = params["b2"] @ params["w3"] + params["b3"]        # (1, 256) f32
    return {
        "w1": params["w1"].astype(bf), "b1": params["b1"],
        "w23": w23.astype(bf),         "b23": b23,
        "w4": params["w4"].astype(bf), "b4": params["b4"],
    }


def _reference_forward_f32(x, params):
    """Pure f32 reference (matches PyTorch numerics, unfused)."""
    h = jnp.maximum(x @ params["w1"] + params["b1"], 0.0)
    z = h @ params["w2"] + params["b2"]
    d = jnp.maximum(z @ params["w3"] + params["b3"], 0.0)
    return jax.nn.sigmoid(d @ params["w4"] + params["b4"])


def _reference_forward_bf16(x, kparams):
    """Reference with the same bf16-in / f32-accumulate / fused-W23 scheme as the kernel."""
    bf = jnp.bfloat16
    dot = lambda a, b: jnp.dot(a.astype(bf), b, preferred_element_type=jnp.float32)
    h = jnp.maximum(dot(x, kparams["w1"]) + kparams["b1"], 0.0)
    d = jnp.maximum(dot(h, kparams["w23"]) + kparams["b23"], 0.0)
    return jax.nn.sigmoid(dot(d, kparams["w4"]) + kparams["b4"])


if __name__ == "__main__":
    key = jax.random.PRNGKey(0)
    pkey, xkey = jax.random.split(key)

    params = init_params(pkey)
    kparams = prepare_kernel_params(params)

    # Small ragged batch: block_b auto-selects 8 -> 2-step parallel grid with a
    # masked partial last tile (exercises the no-pad / no-slice data path).
    B = 10
    x = jax.random.normal(xkey, (B, FEATURES_DIM), jnp.float32)

    out = autoencoder_apply(x, kparams)               # bf16 output by default
    out = jax.block_until_ready(out)
    assert out.shape == (B, OUT)
    assert out.dtype == jnp.bfloat16
    out_f32 = out.astype(jnp.float32)

    # Tight check vs a reference using the same bf16 / fused-W23 matmul scheme.
    ref_bf16 = _reference_forward_bf16(x, kparams)
    assert jnp.allclose(out_f32, ref_bf16, atol=1.5e-2, rtol=0), "mismatch vs bf16 reference"

    # Loose check vs the exact f32 (PyTorch-equivalent) reference.
    ref_f32 = _reference_forward_f32(x, params)
    assert jnp.allclose(out_f32, ref_f32, atol=4e-2, rtol=0), "mismatch vs f32 reference"

    # TODO(synk): take_grad / add_grad (training-time grad bookkeeping) and the
    # linear=False conv encoder/decoder branch are outside this forward kernel.

    print("KERNEL_OK")
</pallas_src>

<mosaic_0001>
module attributes {stable_mosaic.version = 11 : i64} {
  func.func @_ae_kernel(%arg0: i32, %arg1: memref<8x512xf32, #tpu.memory_space<vmem>>, %arg2: memref<512x256xbf16, #tpu.memory_space<vmem>>, %arg3: memref<1x256xf32, #tpu.memory_space<vmem>>, %arg4: memref<256x256xbf16, #tpu.memory_space<vmem>>, %arg5: memref<1x256xf32, #tpu.memory_space<vmem>>, %arg6: memref<256x512xbf16, #tpu.memory_space<vmem>>, %arg7: memref<1x512xf32, #tpu.memory_space<vmem>>, %arg8: memref<8x512xbf16, #tpu.memory_space<vmem>>) attributes {dimension_semantics = [#tpu.dimension_semantics<parallel>], iteration_bounds = array<i64: 2>, scalar_prefetch = 0 : i64, scratch_operands = 0 : i64, tpu.core_type = #tpu.core_type<tc>, window_params = [{transform_indices = @transform_0, window_bounds = array<i64: 8, 512>}, {pipeline_mode = #tpu.pipeline_mode<synchronous>, transform_indices = @transform_1, window_bounds = array<i64: 512, 256>}, {pipeline_mode = #tpu.pipeline_mode<synchronous>, transform_indices = @transform_2, window_bounds = array<i64: 1, 256>}, {pipeline_mode = #tpu.pipeline_mode<synchronous>, transform_indices = @transform_3, window_bounds = array<i64: 256, 256>}, {pipeline_mode = #tpu.pipeline_mode<synchronous>, transform_indices = @transform_4, window_bounds = array<i64: 1, 256>}, {pipeline_mode = #tpu.pipeline_mode<synchronous>, transform_indices = @transform_5, window_bounds = array<i64: 256, 512>}, {pipeline_mode = #tpu.pipeline_mode<synchronous>, transform_indices = @transform_6, window_bounds = array<i64: 1, 512>}, {transform_indices = @transform_7, window_bounds = array<i64: 8, 512>}]} {
    %c0 = arith.constant 0 : index
    %c0_0 = arith.constant 0 : index
    %0 = vector.load %arg1[%c0, %c0_0] : memref<8x512xf32, #tpu.memory_space<vmem>>, vector<8x512xf32>
    %1 = arith.truncf %0 : vector<8x512xf32> to vector<8x512xbf16>
    %c0_1 = arith.constant 0 : index
    %c0_2 = arith.constant 0 : index
    %2 = vector.load %arg2[%c0_1, %c0_2] : memref<512x256xbf16, #tpu.memory_space<vmem>>, vector<512x256xbf16>
    %cst = arith.constant dense<0.000000e+00> : vector<8x256xf32>
    %3 = tpu.matmul %1, %2, %cst {dimension_numbers = #tpu.dot_dimension_numbers<[1], [0], [0], [1], [0, 0, 1, 1], [], []>} : vector<8x512xbf16>, vector<512x256xbf16>, vector<8x256xf32> -> vector<8x256xf32>
    %c0_3 = arith.constant 0 : index
    %c0_4 = arith.constant 0 : index
    %4 = vector.load %arg3[%c0_3, %c0_4] : memref<1x256xf32, #tpu.memory_space<vmem>>, vector<1x256xf32>
    %5 = vector.broadcast %4 : vector<1x256xf32> to vector<8x256xf32>
    %6 = arith.addf %3, %5 : vector<8x256xf32>
    %cst_5 = arith.constant 0.000000e+00 : f32
    %7 = vector.broadcast %cst_5 : f32 to vector<8x256xf32>
    %8 = arith.maximumf %6, %7 : vector<8x256xf32>
    %9 = arith.truncf %8 : vector<8x256xf32> to vector<8x256xbf16>
    %c0_6 = arith.constant 0 : index
    %c0_7 = arith.constant 0 : index
    %10 = vector.load %arg4[%c0_6, %c0_7] : memref<256x256xbf16, #tpu.memory_space<vmem>>, vector<256x256xbf16>
    %cst_8 = arith.constant dense<0.000000e+00> : vector<8x256xf32>
    %11 = tpu.matmul %9, %10, %cst_8 {dimension_numbers = #tpu.dot_dimension_numbers<[1], [0], [0], [1], [0, 0, 1, 1], [], []>} : vector<8x256xbf16>, vector<256x256xbf16>, vector<8x256xf32> -> vector<8x256xf32>
    %c0_9 = arith.constant 0 : index
    %c0_10 = arith.constant 0 : index
    %12 = vector.load %arg5[%c0_9, %c0_10] : memref<1x256xf32, #tpu.memory_space<vmem>>, vector<1x256xf32>
    %13 = vector.broadcast %12 : vector<1x256xf32> to vector<8x256xf32>
    %14 = arith.addf %11, %13 : vector<8x256xf32>
    %cst_11 = arith.constant 0.000000e+00 : f32
    %15 = vector.broadcast %cst_11 : f32 to vector<8x256xf32>
    %16 = arith.maximumf %14, %15 : vector<8x256xf32>
    %17 = arith.truncf %16 : vector<8x256xf32> to vector<8x256xbf16>
    %c0_12 = arith.constant 0 : index
    %c0_13 = arith.constant 0 : index
    %18 = vector.load %arg6[%c0_12, %c0_13] : memref<256x512xbf16, #tpu.memory_space<vmem>>, vector<256x512xbf16>
    %cst_14 = arith.constant dense<0.000000e+00> : vector<8x512xf32>
    %19 = tpu.matmul %17, %18, %cst_14 {dimension_numbers = #tpu.dot_dimension_numbers<[1], [0], [0], [1], [0, 0, 1, 1], [], []>} : vector<8x256xbf16>, vector<256x512xbf16>, vector<8x512xf32> -> vector<8x512xf32>
    %c0_15 = arith.constant 0 : index
    %c0_16 = arith.constant 0 : index
    %20 = vector.load %arg7[%c0_15, %c0_16] : memref<1x512xf32, #tpu.memory_space<vmem>>, vector<1x512xf32>
    %21 = vector.broadcast %20 : vector<1x512xf32> to vector<8x512xf32>
    %22 = arith.addf %19, %21 : vector<8x512xf32>
    %cst_17 = arith.constant 0.000000e+00 : f32
    %23 = vector.broadcast %cst_17 : f32 to vector<8x512xf32>
    %24 = arith.subf %23, %22 : vector<8x512xf32>
    %25 = math.exp %24 : vector<8x512xf32>
    %cst_18 = arith.constant 1.000000e+00 : f32
    %26 = vector.broadcast %cst_18 : f32 to vector<8x512xf32>
    %27 = arith.addf %26, %25 : vector<8x512xf32>
    %28 = tpu.reciprocal %27 {approx = true} : vector<8x512xf32> -> vector<8x512xf32>
    %29 = arith.truncf %28 : vector<8x512xf32> to vector<8x512xbf16>
    %c0_19 = arith.constant 0 : index
    %c0_20 = arith.constant 0 : index
    %30 = vector.load %arg8[%c0_19, %c0_20] : memref<8x512xbf16, #tpu.memory_space<vmem>>, vector<8x512xbf16>
    tpu.vector_store %arg8[%c0_19, %c0_20], %29 {strides = array<i32>} : memref<8x512xbf16, #tpu.memory_space<vmem>>, vector<8x512xbf16>,
    return
  }
  func.func @transform_0(%arg0: i32) -> (i32, i32) {
    %c0_i32 = arith.constant 0 : i32
    %c0_i32_0 = arith.constant 0 : i32
    return %arg0, %c0_i32 : i32, i32
  }
  func.func @transform_1(%arg0: i32) -> (i32, i32) {
    %c0_i32 = arith.constant 0 : i32
    %c0_i32_0 = arith.constant 0 : i32
    %c0_i32_1 = arith.constant 0 : i32
    return %c0_i32, %c0_i32_0 : i32, i32
  }
  func.func @transform_2(%arg0: i32) -> (i32, i32) {
    %c0_i32 = arith.constant 0 : i32
    %c0_i32_0 = arith.constant 0 : i32
    %c0_i32_1 = arith.constant 0 : i32
    return %c0_i32, %c0_i32_0 : i32, i32
  }
  func.func @transform_3(%arg0: i32) -> (i32, i32) {
    %c0_i32 = arith.constant 0 : i32
    %c0_i32_0 = arith.constant 0 : i32
    %c0_i32_1 = arith.constant 0 : i32
    return %c0_i32, %c0_i32_0 : i32, i32
  }
  func.func @transform_4(%arg0: i32) -> (i32, i32) {
    %c0_i32 = arith.constant 0 : i32
    %c0_i32_0 = arith.constant 0 : i32
    %c0_i32_1 = arith.constant 0 : i32
    return %c0_i32, %c0_i32_0 : i32, i32
  }
  func.func @transform_5(%arg0: i32) -> (i32, i32) {
    %c0_i32 = arith.constant 0 : i32
    %c0_i32_0 = arith.constant 0 : i32
    %c0_i32_1 = arith.constant 0 : i32
    return %c0_i32, %c0_i32_0 : i32, i32
  }
  func.func @transform_6(%arg0: i32) -> (i32, i32) {
    %c0_i32 = arith.constant 0 : i32
    %c0_i32_0 = arith.constant 0 : i32
    %c0_i32_1 = arith.constant 0 : i32
    return %c0_i32, %c0_i32_0 : i32, i32
  }
  func.func @transform_7(%arg0: i32) -> (i32, i32) {
    %c0_i32 = arith.constant 0 : i32
    %c0_i32_0 = arith.constant 0 : i32
    return %arg0, %c0_i32 : i32, i32
  }
}

</mosaic_0001>

<bundles_post_ra>
// kernel: autoencoder_forward.1
= control target key start
LH: loop header
LB: loop body
LE: loop exit
PB: predicated region body
PF: predicated region fallthrough
CT: control target
= control target key end

     0   :  { %s2836_s0 = inlined_call_operand.hbm [shape: f32[10,512], index: 0, kind: input, shape index: {}]   ;;  %s2837_s1 = inlined_call_operand.hbm [shape: bf16[512,256], index: 1, kind: input, shape index: {}]   ;;  %s2838_s2 = inlined_call_operand.hbm [shape: f32[1,256], index: 2, kind: input, shape index: {}]   ;;  %s2839_s3 = inlined_call_operand.hbm [shape: bf16[256,256], index: 3, kind: input, shape index: {}]   ;;  %s2840_s4 = inlined_call_operand.hbm [shape: f32[1,256], index: 4, kind: input, shape index: {}]   ;;  %s2841_s5 = inlined_call_operand.hbm [shape: bf16[256,512], index: 5, kind: input, shape index: {}]   ;;  %s2842_s6 = inlined_call_operand.vmem [shape: f32[1,512], index: 6, kind: input, shape index: {}]   ;;  %s2843_s7 = inlined_call_operand.hbm [shape: bf16[10,512], index: 7, kind: output, shape index: {}]  }
   0x1   :  { %2848 = sst [smem:[#allocation19_spill]] %s2837_s1 }
   0x2   :  { %2849 = sst [smem:[#allocation20_spill]] %s2838_s2 }
   0x3   :  { %12 = vsyncpa [#allocation3], 0 }
   0x4   :  { %14 = vsyncpa [#allocation3 + $0x1], 0 }
   0x5   :  { %15 = vsyncpa [#allocation6], 0 }
   0x6   :  { %16 = vsyncpa [#allocation9], 0 }
   0x7   :  { %17 = vsyncpa [#allocation12], 0 }
   0x8   :  { %18 = vsyncpa [#allocation4], 0 }
   0x9   :  { %20 = vsyncpa [#allocation4 + $0x1], 0  ;;  %s2596_s24 = smov 0   ;;  %s2598_s25 = smov 0  }
   0xa   :  { %s2600_s26 = smov 0   ;;  %s2602_s27 = smov 0  }
   0xb LB: > { %s2545_s28 = smov [#allocation5]   ;;  %s2617_s30 = sadd.s32 4294967295, %s2543_s27   ;;  %s2543_s27 = sphi %s2602_s27, %s2874_s27   ;;  %s2539_s26 = sphi %s2600_s26, %s2873_s26   ;;  %s2535_s25 = sphi %s2598_s25, %s2872_s25   ;;  %s2531_s24 = sphi %s2596_s24, %s2871_s24  }
   0xc   : > { %s221_s29 = sshll.u32 %s2545_s28, 4  ;;  %p1763_p0 = scmp.ge.s32.totalorder %s2543_s27, 1  ;;  %s222_s29 = int_to_ptr.vmem [resolvable:$true] %s221_s29 }
   0xd   : > { %p2844_p1 = scmp.eq.s32.totalorder %s2617_s30, 0  ;;  %p209_p2 = scmp.lt.s32.totalorder %s2543_s27, 3 }
   0xe   : > { %s2546_s9 = smov [#allocation8]   ;;  %s2547_s12 = smov [#allocation7]  }
   0xf   : > { %p2622_p3 = pnand %p1763_p0, %p209_p2  ;;  %s245_s10 = sshll.u32 %s2546_s9, 4  ;;  %s2635_s10 = int_to_ptr.vmem [resolvable:$true] %s245_s10 }
  0x10   : > { %s235_s13 = sshll.u32 %s2547_s12, 4  ;;  %s2320_s15 = scalar_lea.vmem %s222_s29, 8192  ;;  %s2637_s13 = int_to_ptr.vmem [resolvable:$true] %s235_s13 }
  0x11   : > { %s2850_s8 = scalar_select %p2622_p3, 1, 0 }
  0x12   : > { %p1976_p5 = pneg %p2622_p3  ;;  %p2321_p8 = scmp.ne.s32.totalorder %s222_s29, %s2320_s15 }
  0x13   : > { %p2328_p11 = scmp.lt.s32.totalorder %s222_s29, %s222_s29  ;;  %p2329_p12 = scmp.lt.s32.totalorder %s2320_s15, %s2320_s15 }
  0x14   : > { %p2631_p6 = pnand %p1976_p5, %p2844_p1 }
  0x15   : > { %p2330_p13 = por %p2329_p12, %p2328_p11 }
  0x16   : > { %p2641_p7 = pneg %p2631_p6 }
  0x18   : > { %p2323_p9 = pnand %p2321_p8, %p2641_p7 }
  0x1a   : > { %p2324_p10 = pneg %p2323_p9 }
  0x1c   : > { %p2331_p0 = pnand %p2330_p13, %p2324_p10 }
  0x1e   : > { %2334 = shalt.err (!%p2331_p0)
}
  0x1f   : > { %s2548_s16 = smov 128   ;;  %s2549_s17 = smov 8  }
  0x20   : > { %s2853_s1 = sld [smem:[#allocation19_spill]]  ;;  %s2346_s20 = scalar_lea.vmem %s2635_s10, 4096 }
  0x21   : > { %p2347_p2 = scmp.ne.s32.totalorder %s2635_s10, %s2346_s20  ;;  %p2354_p9 = scmp.lt.s32.totalorder %s2635_s10, %s2635_s10 }
  0x22   : > { %p2355_p10 = scmp.lt.s32.totalorder %s2346_s20, %s2346_s20 }
  0x23   : > { %p2349_p5 = pnand %p2347_p2, %p2641_p7 }
  0x24   : > { %p2356_p11 = por %p2355_p10, %p2354_p9 }
  0x25   : > { %p2350_p8 = pneg %p2349_p5 }
  0x26   : > { %1979 = dma.hbm_to_vmem [thread:$0]  (!%p2631_p6), %s2853_s1, 8192, %s222_s29, [#allocation6], %s2548_s16, %s2548_s16, %s2549_s17  }
  0x27   : > { %p2357_p12 = pnand %p2356_p11, %p2350_p8 }
  0x29   : > { %2360 = shalt.err (!%p2357_p12)
}
  0x2a   : > { %1985 = dma.hbm_to_vmem [thread:$0]  (!%p2631_p6), %s2839_s3, 4096, %s2635_s10, [#allocation9], %s2548_s16, %s2548_s16, %s2549_s17  }
  0x2b   : > { %s2372_s23 = scalar_lea.vmem %s2637_s13, 32  ;;  %p2380_p5 = scmp.lt.s32.totalorder %s2637_s13, %s2637_s13 }
  0x2c   : > { %p2373_p13 = scmp.ne.s32.totalorder %s2637_s13, %s2372_s23  ;;  %p2381_p8 = scmp.lt.s32.totalorder %s2372_s23, %s2372_s23 }
  0x2e   : > { %p2375_p0 = pnand %p2373_p13, %p2641_p7  ;;  %p2382_p9 = por %p2381_p8, %p2380_p5 }
  0x30   : > { %p2376_p2 = pneg %p2375_p0 }
  0x32   : > { %p2383_p10 = pnand %p2382_p9, %p2376_p2 }
  0x34   : > { %2386 = shalt.err (!%p2383_p10)
}
  0x35   : > { %s2854_s2 = sld [smem:[#allocation20_spill]]  ;;  %s2550_s9 = smov [#allocation10]  }
  0x36   : > { %s259_s10 = sshll.u32 %s2550_s9, 4  ;;  %s2551_s12 = smov [#allocation11]   ;;  %s260_s10 = int_to_ptr.vmem [resolvable:$true] %s259_s10 }
  0x37   : > { %s269_s15 = sshll.u32 %s2551_s12, 4  ;;  %s2398_s16 = scalar_lea.vmem %s260_s10, 32  ;;  %s270_s15 = int_to_ptr.vmem [resolvable:$true] %s269_s15 }
  0x38   : > { %p2399_p11 = scmp.ne.s32.totalorder %s260_s10, %s2398_s16  ;;  %p2406_p0 = scmp.lt.s32.totalorder %s260_s10, %s260_s10 }
  0x39   : > { %p2407_p2 = scmp.lt.s32.totalorder %s2398_s16, %s2398_s16 }
  0x3a   : > { %p2401_p12 = pnand %p2399_p11, %p2641_p7 }
  0x3b   : > { %1982 = dma.hbm_to_vmem [thread:$0]  (!%p2631_p6), %s2854_s2, 32, %s2637_s13, [#allocation6]  }
  0x3c   : > { %p2402_p13 = pneg %p2401_p12  ;;  %p2408_p5 = por %p2407_p2, %p2406_p0 }
  0x3e   : > { %p2409_p8 = pnand %p2408_p5, %p2402_p13 }
  0x40   : > { %2412 = shalt.err (!%p2409_p8)
}
  0x41   : > { %1988 = dma.hbm_to_vmem [thread:$0]  (!%p2631_p6), %s2840_s4, 32, %s260_s10, [#allocation9]  }
  0x42   : > { %s2424_s13 = scalar_lea.vmem %s270_s15, 8192  ;;  %p2432_p11 = scmp.lt.s32.totalorder %s270_s15, %s270_s15 }
  0x43   : > { %p2425_p9 = scmp.ne.s32.totalorder %s270_s15, %s2424_s13  ;;  %p2433_p12 = scmp.lt.s32.totalorder %s2424_s13, %s2424_s13 }
  0x45   : > { %p2427_p10 = pnand %p2425_p9, %p2641_p7  ;;  %p2434_p1 = por %p2433_p12, %p2432_p11 }
  0x47   : > { %p2428_p4 = pneg %p2427_p10 }
  0x49   : > { %p2435_p3 = pnand %p2434_p1, %p2428_p4 }
  0x4b   : > { %2438 = shalt.err (!%p2435_p3)
}
  0x4c   : > { %s2552_s19 = smov 256   ;;  %s2553_s14 = smov 16  }
  0x4d   : > { %1991 = dma.hbm_to_vmem [thread:$0]  (!%p2631_p6), %s2841_s5, 8192, %s270_s15, [#allocation12], %s2552_s19, %s2552_s19, %s2553_s14  }
  0x4e   : > { %s1762_s22 = sadd.s32 4294967294, %s2543_s27   ;;  %s2692_s23 = sadd.s32 1, %s2543_s27  }
  0x4f   : > { %s33_s28 = sadd.s32 1, %s2539_s26  ;;  %s30_s29 = ssub.s32 %s2543_s27, %s2692_s23 }
  0x50   : > { %p40_p1 = scmp.ne.s32.totalorder %s2539_s26, %s2535_s25  ;;  %p31_p3 = scmp.eq.s32.totalorder %s30_s29, 0 }
  0x51   : > { %p41_p4 = scmp.eq.s32.totalorder %s2543_s27, 0  ;;  %p46_p7 = scmp.ne.s32.totalorder %s2535_s25, %s2531_s24 }
  0x52   : > { %p196_p13 = scmp.eq.s32.totalorder %s2617_s30, 1  ;;  %p2855_p2 = scmp.eq.s32.totalorder %s2617_s30, 0 }
  0x53   : > { %s2704_s9 = scalar_select %p31_p3, %s2539_s26, %s33_s28  }
  0x54   : > { %p42_p0 = por %p41_p4, %p40_p1  ;;  %p2708_p5 = por %p2855_p2, %p46_p7 }
  0x55   : > { %p2712_p6 = por %p196_p13, %p40_p1  ;;  %p202_p8 = scmp.eq.s32.totalorder %s1762_s22, 1 }
  0x56   : > { %s2856_s11 = scalar_select %p2708_p5, 1, 0 }
  0x57   : > { %s2857_s10 = scalar_select %p2712_p6, 1, 0 }
  0x58   : > { %p2005_p9 = scmp.lt.s32.totalorder %s2543_s27, 2  ;;  %s286_s12 = sand.u32 1, %s2539_s26  }
  0x59   : > { %p2718_p10 = por %p202_p8, %p46_p7  ;;  %s1770_s16 = sshll.u32 %s286_s12, 5 }
  0x5a   : > { %s1948_s17 = sshll.u32 %s2543_s27, 9  ;;  %s290_s14 = scalar_lea.vmem [#allocation2], %s1770_s16 }
  0x5b   : > { %s2858_s15 = scalar_select %p2718_p10, 1, 0 }
  0x5c   : > { %s2726_s19 = scalar_lea.hbm %s2836_s0, %s1948_s17  ;;  %s298_s20 = sshll.u32 %s290_s14, 4  ;;  %s299_s20 = int_to_ptr.vmem [resolvable:$true] %s298_s20 }
  0x5d   : > { %p2728_p11 = pnand %p2005_p9, %p42_p0  ;;  %s287_s22 = scalar_lea.sflag [#allocation3], %s286_s12 }
  0x5e   : > { %s2439_s28 = scalar_lea.hbm %s2726_s19, 512  ;;  %s2444_s18 = scalar_lea.hbm %s2836_s0, 1024 }
  0x5f   : > { %p2440_p12 = scmp.ne.s32.totalorder %s2726_s19, %s2439_s28  ;;  %p2441_p1 = pneg %p2728_p11 }
  0x60   : > { %p2445_p7 = scmp.lt.s32.totalorder %s2726_s19, %s2836_s0  ;;  %p2446_p13 = scmp.lt.s32.totalorder %s2444_s18, %s2439_s28 }
  0x61   : > { %p2442_p3 = pnand %p2441_p1, %p2440_p12 }
  0x62   : > { %p2447_p0 = por %p2446_p13, %p2445_p7 }
  0x63   : > { %p2443_p4 = pneg %p2442_p3 }
  0x65   : > { %p2448_p2 = pnand %p2447_p0, %p2443_p4 }
  0x67   : > { %2451 = shalt.err (!%p2448_p2)
}
  0x68   : > { %s2452_s14 = scalar_lea.vmem %s299_s20, 512  ;;  %s2554_s12 = smov [#allocation2]  }
  0x69   : > { %p2453_p8 = scmp.ne.s32.totalorder %s299_s20, %s2452_s14  ;;  %s2457_s1 = sshll.u32 %s2554_s12, 4  ;;  %s2458_s1 = int_to_ptr.vmem [resolvable:$false] %s2457_s1 }
  0x6a   : > { %s2459_s2 = scalar_lea.vmem %s2458_s1, 1024  ;;  %p2460_p12 = scmp.lt.s32.totalorder %s299_s20, %s2458_s1 }
  0x6b   : > { %p2455_p9 = pnand %p2453_p8, %p2441_p1  ;;  %p2461_p3 = scmp.lt.s32.totalorder %s2459_s2, %s2452_s14 }
  0x6d   : > { %p2456_p10 = pneg %p2455_p9  ;;  %p2462_p6 = por %p2461_p3, %p2460_p12 }
  0x6f   : > { %p2463_p5 = pnand %p2462_p6, %p2456_p10 }
  0x71   : > { %2466 = shalt.err (!%p2463_p5)
}
  0x72   : > { %1995 = dma.hbm_to_vmem [thread:$0]  (!%p2728_p11), %s2726_s19, 512, %s299_s20, %s287_s22  }
  0x73   : > { %p2860_p4 = scmp.ne.s32.totalorder %s2850_s8, 0 }
  0x74   : > { %s2749_s28 = sand.u32 (!%p2860_p4), 1, %s2535_s25   ;;  %p2861_p1 = scmp.ne.s32.totalorder (!%p2860_p4), %s2856_s11, 0 }
  0x75   : > { %307 = sbr.rel (%p2860_p4) target bundleno = 850 (0x352), region = 48  ;;  %s1774_s29 = sshll.u32 (!%p2860_p4), %s2749_s28, 5 }
  0x76   : > { %s310_s17 = scalar_lea.sflag (!%p2860_p4), [#allocation3], %s2749_s28  ;;  %s2753_s1 = scalar_lea.vmem (!%p2860_p4), [#allocation2], %s1774_s29 }
  0x7a   : > { %2510 = dma.done.wait (%p2861_p1), %s310_s17, 512  }
  0x7b   : > { %2512 = vsyncadd (%p2861_p1), %s310_s17, 4294966784  ;;  %p2862_p5 = scmp.eq.s32.totalorder %s2617_s30, 0 }
  0x7d   : > { %2514 = dma.done.wait (%p2862_p5), [#allocation6], 8224   ;;  %p2863_p6 = pmov %p2862_p5 }
  0x7e   : > { %p2864_p10 = pmov %p2862_p5 }
  0x7f   : > { %2516 = vsyncadd (%p2863_p6), [#allocation6], 4294959072 }
  0x80   : > { %2518 = dma.done.wait (%p2864_p10), [#allocation9], 4128   ;;  %p2865_p11 = pmov %p2862_p5 }
  0x81   : > { %p2866_p7 = pmov %p2862_p5 }
  0x82   : > { %2520 = vsyncadd (%p2865_p11), [#allocation9], 4294963168 }
  0x83   : > { %2522 = dma.done.wait (%p2866_p7), [#allocation12], 8192   ;;  %p2867_p13 = pmov %p2862_p5 }
  0x84   : > { %v2053_v0 = vld [vmem:[#allocation5 + $0x74] ss:$8 sps:$4 sm:$0xff]   ;;  %v2057_v2 = vld [vmem:[#allocation5 + $0x70] ss:$8 sps:$4 sm:$0xff]   ;;  %v2059_v4 = vld [vmem:[#allocation5 + $0x64] ss:$8 sps:$4 sm:$0xff]  }
  0x85   : > { %2524 = vsyncadd (%p2867_p13), [#allocation12], 4294959104  ;;  %v2055_v1 = vld [vmem:[#allocation5 + $0x174] ss:$8 sps:$4 sm:$0xff]   ;;  %768 = vmatprep.subr.bf16.mxu0 %v2053_v0  ;;  %v2058_v3 = vld [vmem:[#allocation5 + $0x170] ss:$8 sps:$4 sm:$0xff]  }
  0x86   : > { %809 = vmatprep.subr.bf16.mxu1 %v2055_v1  ;;  %769 = vmatpush1.bf16.msra.mxu0 %v2057_v2  ;;  %v2061_v5 = vld [vmem:[#allocation5 + $0x164] ss:$8 sps:$4 sm:$0xff]   ;;  %v2063_v6 = vld [vmem:[#allocation5 + $0x60] ss:$8 sps:$4 sm:$0xff]   ;;  %v2065_v8 = vld [vmem:[#allocation5 + $0x54] ss:$8 sps:$4 sm:$0xff]  }
  0x87   : > { %810 = vmatpush1.bf16.msra.mxu1 %v2058_v3  ;;  %770 = vmatprep.subr.bf16.mxu0 %v2059_v4  ;;  %v2064_v7 = vld [vmem:[#allocation5 + $0x160] ss:$8 sps:$4 sm:$0xff]   ;;  %v2067_v9 = vld [vmem:[#allocation5 + $0x154] ss:$8 sps:$4 sm:$0xff]   ;;  %v2069_v10 = vld [vmem:[#allocation5 + $0x50] ss:$8 sps:$4 sm:$0xff]  }
  0x88   : > { %811 = vmatprep.subr.bf16.mxu1 %v2061_v5  ;;  %v2070_v11 = vld [vmem:[#allocation5 + $0x150] ss:$8 sps:$4 sm:$0xff]   ;;  %v2071_v12 = vld [vmem:[#allocation5 + $0x44] ss:$8 sps:$4 sm:$0xff]   ;;  %v2075_v14 = vld [vmem:[#allocation5 + $0x40] ss:$8 sps:$4 sm:$0xff]  }
  0x89   : > { %v2073_v13 = vld [vmem:[#allocation5 + $0x144] ss:$8 sps:$4 sm:$0xff]   ;;  %v2076_v15 = vld [vmem:[#allocation5 + $0x140] ss:$8 sps:$4 sm:$0xff]   ;;  %v2077_v16 = vld [vmem:[#allocation5 + $0x34] ss:$8 sps:$4 sm:$0xff]  }
  0x8a   : > { %771 = vmatpush1.bf16.msra.mxu0 %v2063_v6  ;;  %v2079_v17 = vld [vmem:[#allocation5 + $0x134] ss:$8 sps:$4 sm:$0xff]   ;;  %v2081_v18 = vld [vmem:[#allocation5 + $0x30] ss:$8 sps:$4 sm:$0xff]   ;;  %v2083_v20 = vld [vmem:[#allocation5 + $0x24] ss:$8 sps:$4 sm:$0xff]  }
  0x8b   : > { %812 = vmatpush1.bf16.msra.mxu1 %v2064_v7  ;;  %772 = vmatprep.subr.bf16.mxu0 %v2065_v8  ;;  %v2082_v19 = vld [vmem:[#allocation5 + $0x130] ss:$8 sps:$4 sm:$0xff]   ;;  %v2085_v21 = vld [vmem:[#allocation5 + $0x124] ss:$8 sps:$4 sm:$0xff]   ;;  %v2087_v22 = vld [vmem:[#allocation5 + $0x20] ss:$8 sps:$4 sm:$0xff]  }
  0x8c   : > { %813 = vmatprep.subr.bf16.mxu1 %v2067_v9  ;;  %v2088_v23 = vld [vmem:[#allocation5 + $0x120] ss:$8 sps:$4 sm:$0xff]   ;;  %v2089_v24 = vld [vmem:[#allocation5 + $0x14] ss:$8 sps:$4 sm:$0xff]   ;;  %v2093_v26 = vld [vmem:[#allocation5 + $0x10] ss:$8 sps:$4 sm:$0xff]  }
  0x8d   : > { %v2091_v25 = vld [vmem:[#allocation5 + $0x114] ss:$8 sps:$4 sm:$0xff]   ;;  %v2094_v27 = vld [vmem:[#allocation5 + $0x110] ss:$8 sps:$4 sm:$0xff]   ;;  %v2095_v28 = vld [vmem:[#allocation5 + $0x4] ss:$8 sps:$4 sm:$0xff]  }
  0x8e   : > { %773 = vmatpush1.bf16.msra.mxu0 %v2069_v10  ;;  %v2097_v29 = vld [vmem:[#allocation5 + $0x104] ss:$8 sps:$4 sm:$0xff]   ;;  %v2099_v30 = vld [vmem:[#allocation5] ss:$8 sps:$4 sm:$0xff]   ;;  %v2101_v32 = vld [vmem:[#allocation5 + $0xf4] ss:$8 sps:$4 sm:$0xff]  }
  0x8f   : > { %814 = vmatpush1.bf16.msra.mxu1 %v2070_v11  ;;  %774 = vmatprep.subr.bf16.mxu0 %v2071_v12  ;;  %v2100_v31 = vld [vmem:[#allocation5 + $0x100] ss:$8 sps:$4 sm:$0xff]   ;;  %v2103_v33 = vld [vmem:[#allocation5 + $0x1f4] ss:$8 sps:$4 sm:$0xff]   ;;  %v2105_v34 = vld [vmem:[#allocation5 + $0xf0] ss:$8 sps:$4 sm:$0xff]  }
  0x90   : > { %815 = vmatprep.subr.bf16.mxu1 %v2073_v13  ;;  %v2106_v35 = vld [vmem:[#allocation5 + $0x1f0] ss:$8 sps:$4 sm:$0xff]   ;;  %v2107_v36 = vld [vmem:[#allocation5 + $0xe4] ss:$8 sps:$4 sm:$0xff]   ;;  %v2111_v38 = vld [vmem:[#allocation5 + $0xe0] ss:$8 sps:$4 sm:$0xff]  }
  0x91   : > { %v2109_v37 = vld [vmem:[#allocation5 + $0x1e4] ss:$8 sps:$4 sm:$0xff]   ;;  %v2112_v39 = vld [vmem:[#allocation5 + $0x1e0] ss:$8 sps:$4 sm:$0xff]   ;;  %v2113_v40 = vld [vmem:[#allocation5 + $0xd4] ss:$8 sps:$4 sm:$0xff]  }
  0x92   : > { %775 = vmatpush1.bf16.msra.mxu0 %v2075_v14  ;;  %v2115_v41 = vld [vmem:[#allocation5 + $0x1d4] ss:$8 sps:$4 sm:$0xff]   ;;  %v2117_v42 = vld [vmem:[#allocation5 + $0xd0] ss:$8 sps:$4 sm:$0xff]   ;;  %v2119_v44 = vld [vmem:[#allocation5 + $0xc4] ss:$8 sps:$4 sm:$0xff]  }
  0x93   : > { %816 = vmatpush1.bf16.msra.mxu1 %v2076_v15  ;;  %776 = vmatprep.subr.bf16.mxu0 %v2077_v16  ;;  %v2118_v43 = vld [vmem:[#allocation5 + $0x1d0] ss:$8 sps:$4 sm:$0xff]   ;;  %v2121_v45 = vld [vmem:[#allocation5 + $0x1c4] ss:$8 sps:$4 sm:$0xff]   ;;  %v2123_v47 = vld [vmem:[#allocation5 + $0xc0] ss:$8 sps:$4 sm:$0xff]  }
  0x94   : > { %817 = vmatprep.subr.bf16.mxu1 %v2079_v17  ;;  %v365_v46 = vld [vmem:[%s2753_s1 + $0x8] sm:$0xff]  ;;  %v367_v50 = vld [vmem:[%s2753_s1 + $0x18] sm:$0xff]  ;;  %v364_v4 = vld [vmem:[%s2753_s1] sm:$0xff]  ;;  %s1780_s11 = sshll.u32 %s2749_s28, 4  ;;  %s1951_s19 = sshll.u32 %s2617_s30, 8 }
  0x95   : > { %v2124_v48 = vld [vmem:[#allocation5 + $0x1c0] ss:$8 sps:$4 sm:$0xff]   ;;  %v369_v49 = vpack.c.bf16 %v365_v46, %v365_v46  ;;  %v2125_v51 = vld [vmem:[#allocation5 + $0xb4] ss:$8 sps:$4 sm:$0xff]   ;;  %v371_v52 = vpack.c.bf16 %v367_v50, %v367_v50  ;;  %v2129_v54 = vld [vmem:[#allocation5 + $0xb0] ss:$8 sps:$4 sm:$0xff]   ;;  %v368_v8 = vpack.c.bf16 %v364_v4, %v364_v4  ;;  %s2799_s13 = scalar_lea.hbm %s2843_s7, %s1951_s19 }
  0x96   : > { %777 = vmatpush1.bf16.msra.mxu0 %v2081_v18  ;;  %v2127_v53 = vld [vmem:[#allocation5 + $0x1b4] ss:$8 sps:$4 sm:$0xff]   ;;  %v2130_v55 = vld [vmem:[#allocation5 + $0x1b0] ss:$8 sps:$4 sm:$0xff]   ;;  %v2131_v56 = vld [vmem:[#allocation5 + $0xa4] ss:$8 sps:$4 sm:$0xff]  }
  0x97   : > { %818 = vmatpush1.bf16.msra.mxu1 %v2082_v19  ;;  %778 = vmatprep.subr.bf16.mxu0 %v2083_v20  ;;  %v2133_v57 = vld [vmem:[#allocation5 + $0x1a4] ss:$8 sps:$4 sm:$0xff]   ;;  %v2135_v58 = vld [vmem:[#allocation5 + $0xa0] ss:$8 sps:$4 sm:$0xff]   ;;  %v2137_v60 = vld [vmem:[#allocation5 + $0x94] ss:$8 sps:$4 sm:$0xff]  }
  0x98   : > { %819 = vmatprep.subr.bf16.mxu1 %v2085_v21  ;;  %800 = vmatprep.mubr.bf16.mxu0 %v369_v49  ;;  %v2136_v59 = vld [vmem:[#allocation5 + $0x1a0] ss:$8 sps:$4 sm:$0xff]   ;;  %v2139_v61 = vld [vmem:[#allocation5 + $0x194] ss:$8 sps:$4 sm:$0xff]   ;;  %v2141_v62 = vld [vmem:[#allocation5 + $0x90] ss:$8 sps:$4 sm:$0xff]  }
  0x99   : > { %841 = vmatprep.mubr.bf16.mxu1 %v371_v52  ;;  %v2142_v63 = vld [vmem:[#allocation5 + $0x190] ss:$8 sps:$4 sm:$0xff]   ;;  %v2143_v0 = vld [vmem:[#allocation5 + $0x84] ss:$8 sps:$4 sm:$0xff]   ;;  %v2147_v2 = vld [vmem:[#allocation5 + $0x80] ss:$8 sps:$4 sm:$0xff]  }
  0x9a   : > { %779 = vmatpush1.bf16.msra.mxu0 %v2087_v22  ;;  %v2145_v1 = vld [vmem:[#allocation5 + $0x184] ss:$8 sps:$4 sm:$0xff]   ;;  %v2148_v3 = vld [vmem:[#allocation5 + $0x180] ss:$8 sps:$4 sm:$0xff]   ;;  %v366_v5 = vld [vmem:[%s2753_s1 + $0x10] sm:$0xff]  ;;  %s363_s20 = scalar_lea.vmem [#allocation13], %s1780_s11 }
  0x9b   : > { %820 = vmatpush1.bf16.msra.mxu1 %v2088_v23  ;;  %780 = vmatprep.subr.bf16.mxu0 %v2089_v24  ;;  %v2151_v6 = vld [vmem:[#allocation8 + $0x74] ss:$8 sps:$4 sm:$0xff]   ;;  %v2149_v7 = vld [vmem:[#allocation8 + $0x70] ss:$8 sps:$4 sm:$0xff]   ;;  %v370_v9 = vpack.c.bf16 %v366_v5, %v366_v5  ;;  %v2154_v10 = vld [vmem:[#allocation8 + $0x64] ss:$8 sps:$4 sm:$0xff]   ;;  %v438_v5 = vlaneseq }
  0x9c   : > { %821 = vmatprep.subr.bf16.mxu1 %v2091_v25  ;;  %v2152_v11 = vld [vmem:[#allocation8 + $0x60] ss:$8 sps:$4 sm:$0xff]   ;;  %v2157_v12 = vld [vmem:[#allocation8 + $0x54] ss:$8 sps:$4 sm:$0xff]   ;;  %v2155_v13 = vld [vmem:[#allocation8 + $0x50] ss:$8 sps:$4 sm:$0xff]  }
  0x9d   : > { %v2160_v14 = vld [vmem:[#allocation8 + $0x44] ss:$8 sps:$4 sm:$0xff]   ;;  %v2158_v15 = vld [vmem:[#allocation8 + $0x40] ss:$8 sps:$4 sm:$0xff]   ;;  %v2163_v16 = vld [vmem:[#allocation8 + $0x34] ss:$8 sps:$4 sm:$0xff]  }
  0x9e   : > { %781 = vmatpush1.bf16.msra.mxu0 %v2093_v26  ;;  %v2161_v17 = vld [vmem:[#allocation8 + $0x30] ss:$8 sps:$4 sm:$0xff]   ;;  %v2166_v18 = vld [vmem:[#allocation8 + $0x24] ss:$8 sps:$4 sm:$0xff]   ;;  %v2164_v19 = vld [vmem:[#allocation8 + $0x20] ss:$8 sps:$4 sm:$0xff]  }
  0x9f   : > { %822 = vmatpush1.bf16.msra.mxu1 %v2094_v27  ;;  %782 = vmatprep.subr.bf16.mxu0 %v2095_v28  ;;  %v2169_v20 = vld [vmem:[#allocation8 + $0x14] ss:$8 sps:$4 sm:$0xff]   ;;  %v2167_v21 = vld [vmem:[#allocation8 + $0x10] ss:$8 sps:$4 sm:$0xff]   ;;  %v2172_v22 = vld [vmem:[#allocation8 + $0x4] ss:$8 sps:$4 sm:$0xff]  }
  0xa0   : > { %823 = vmatprep.subr.bf16.mxu1 %v2097_v29  ;;  %v2170_v23 = vld [vmem:[#allocation8] ss:$8 sps:$4 sm:$0xff]   ;;  %v2175_v24 = vld [vmem:[#allocation8 + $0xf4] ss:$8 sps:$4 sm:$0xff]   ;;  %v2173_v25 = vld [vmem:[#allocation8 + $0xf0] ss:$8 sps:$4 sm:$0xff]  }
  0xa1   : > { %v2178_v26 = vld [vmem:[#allocation8 + $0xe4] ss:$8 sps:$4 sm:$0xff]   ;;  %v2176_v27 = vld [vmem:[#allocation8 + $0xe0] ss:$8 sps:$4 sm:$0xff]   ;;  %v2181_v28 = vld [vmem:[#allocation8 + $0xd4] ss:$8 sps:$4 sm:$0xff]  }
  0xa2   : > { %783 = vmatpush1.bf16.msra.mxu0 %v2099_v30  ;;  %v2179_v29 = vld [vmem:[#allocation8 + $0xd0] ss:$8 sps:$4 sm:$0xff]   ;;  %v2184_v30 = vld [vmem:[#allocation8 + $0xc4] ss:$8 sps:$4 sm:$0xff]   ;;  %s1644_s21 = sshll.u32 %s363_s20, 4  ;;  %s1630_s16 = scalar_lea.sflag [#allocation4], %s2749_s28  ;;  %s1645_s21 = int_to_ptr.vmem [resolvable:$true] %s1644_s21 }
  0xa3   : > { %824 = vmatpush1.bf16.msra.mxu1 %v2100_v31  ;;  %784 = vmatprep.subr.bf16.mxu0 %v2101_v32  ;;  %v2182_v31 = vld [vmem:[#allocation8 + $0xc0] ss:$8 sps:$4 sm:$0xff]   ;;  %v2187_v32 = vld [vmem:[#allocation8 + $0xb4] ss:$8 sps:$4 sm:$0xff]   ;;  %s2467_s14 = scalar_lea.vmem %s1645_s21, 256  ;;  %p2868_p2 = scmp.ne.s32.totalorder %s2857_s10, 0 }
  0xa4   : > { %825 = vmatprep.subr.bf16.mxu1 %v2103_v33  ;;  %v2185_v33 = vld [vmem:[#allocation8 + $0xb0] ss:$8 sps:$4 sm:$0xff]   ;;  %p2468_p0 = scmp.ne.s32.totalorder %s1645_s21, %s2467_s14  ;;  %s2555_s30 = smov [#allocation13]  }
  0xa5   : > { %v2209_v46 = vld [vmem:[#allocation11 + $0xa0] ss:$16 sps:$4 sm:$0xff]   ;;  %v2223_v49 = vld [vmem:[#allocation11 + $0x64] ss:$16 sps:$4 sm:$0xff]   ;;  %s2471_s12 = sshll.u32 %s2555_s30, 4  ;;  %s2472_s12 = int_to_ptr.vmem [resolvable:$false] %s2471_s12 }
  0xa6   : > { %785 = vmatpush2.bf16.msra.mxu0 %v2105_v34  ;;  %v2190_v34 = vld [vmem:[#allocation8 + $0xa4] ss:$8 sps:$4 sm:$0xff]   ;;  %p2469_p8 = pnand %p2468_p0, %p2868_p2  ;;  %s2473_s29 = scalar_lea.vmem %s2472_s12, 512 }
  0xa7   : > { %826 = vmatpush2.bf16.msra.mxu1 %v2106_v35  ;;  %786 = vmatprep.subr.bf16.mxu0 %v2107_v36  ;;  %v2188_v35 = vld [vmem:[#allocation8 + $0xa0] ss:$8 sps:$4 sm:$0xff]   ;;  %v2193_v36 = vld [vmem:[#allocation8 + $0x94] ss:$8 sps:$4 sm:$0xff]   ;;  %p2474_p12 = scmp.lt.s32.totalorder %s1645_s21, %s2472_s12  ;;  %p2475_p3 = scmp.lt.s32.totalorder %s2473_s29, %s2467_s14 }
  0xa8   : > { %827 = vmatprep.subr.bf16.mxu1 %v2109_v37  ;;  %v2191_v37 = vld [vmem:[#allocation8 + $0x90] ss:$8 sps:$4 sm:$0xff]   ;;  %p2470_p9 = pneg %p2469_p8 }
  0xa9   : > { %v2221_v50 = vld [vmem:[#allocation11 + $0x60] ss:$16 sps:$4 sm:$0xff]   ;;  %p2476_p4 = por %p2475_p3, %p2474_p12 }
  0xaa   : > { %787 = vmatpush2.bf16.msra.mxu0 %v2111_v38  ;;  %v2196_v38 = vld [vmem:[#allocation8 + $0x84] ss:$8 sps:$4 sm:$0xff]  }
  0xab   : > { %828 = vmatpush2.bf16.msra.mxu1 %v2112_v39  ;;  %788 = vmatprep.subr.bf16.mxu0 %v2113_v40  ;;  %v2194_v39 = vld [vmem:[#allocation8 + $0x80] ss:$8 sps:$4 sm:$0xff]   ;;  %p2477_p1 = pnand %p2476_p4, %p2470_p9 }
  0xac   : > { %829 = vmatprep.subr.bf16.mxu1 %v2115_v41  ;;  %v2197_v40 = vld [vmem:[#allocation11 + $0xe0] ss:$16 sps:$4 sm:$0xff]   ;;  %v2199_v41 = vld [vmem:[#allocation11 + $0xe4] ss:$16 sps:$4 sm:$0xff]  }
  0xad   : > { %v2227_v52 = vld [vmem:[#allocation11 + $0x40] ss:$16 sps:$4 sm:$0xff]  }
  0xae   : > { %789 = vmatpush2.bf16.msra.mxu0 %v2117_v42  ;;  %v2202_v42 = vld [vmem:[#allocation11 + $0xec] ss:$16 sps:$4 sm:$0xff]   ;;  %v2275_v4 = vld [vmem:[#allocation11 + $0x140] ss:$16 sps:$4 sm:$0xff]  }
  0xaf   : > { %830 = vmatpush2.bf16.msra.mxu1 %v2118_v43  ;;  %790 = vmatprep.subr.bf16.mxu0 %v2119_v44  ;;  %v2205_v43 = vld [vmem:[#allocation11 + $0xc4] ss:$16 sps:$4 sm:$0xff]   ;;  %v2203_v44 = vld [vmem:[#allocation11 + $0xc0] ss:$16 sps:$4 sm:$0xff]  }
  0xb0   : > { %831 = vmatprep.subr.bf16.mxu1 %v2121_v45  ;;  %v2211_v45 = vld [vmem:[#allocation11 + $0xa4] ss:$16 sps:$4 sm:$0xff]  }
  0xb2   : > { %791 = vmatpush2.bf16.msra.mxu0 %v2123_v47  ;;  %v2217_v47 = vld [vmem:[#allocation11 + $0x84] ss:$16 sps:$4 sm:$0xff]  }
  0xb3   : > { %832 = vmatpush2.bf16.msra.mxu1 %v2124_v48  ;;  %792 = vmatprep.subr.bf16.mxu0 %v2125_v51  ;;  %v2215_v48 = vld [vmem:[#allocation11 + $0x80] ss:$16 sps:$4 sm:$0xff]   ;;  %v2229_v51 = vld [vmem:[#allocation11 + $0x44] ss:$16 sps:$4 sm:$0xff]  }
  0xb4   : > { %833 = vmatprep.subr.bf16.mxu1 %v2127_v53  ;;  %v2235_v53 = vld [vmem:[#allocation11 + $0x24] ss:$16 sps:$4 sm:$0xff]  }
  0xb6   : > { %793 = vmatpush2.bf16.msra.mxu0 %v2129_v54  ;;  %v2233_v54 = vld [vmem:[#allocation11 + $0x20] ss:$16 sps:$4 sm:$0xff]  }
  0xb7   : > { %834 = vmatpush2.bf16.msra.mxu1 %v2130_v55  ;;  %794 = vmatprep.subr.bf16.mxu0 %v2131_v56  ;;  %v2241_v55 = vld [vmem:[#allocation11 + $0x4] ss:$16 sps:$4 sm:$0xff]   ;;  %v2239_v56 = vld [vmem:[#allocation11] ss:$16 sps:$4 sm:$0xff]  }
  0xb8   : > { %835 = vmatprep.subr.bf16.mxu1 %v2133_v57  ;;  %v2247_v57 = vld [vmem:[#allocation11 + $0x1e4] ss:$16 sps:$4 sm:$0xff]  }
  0xba   : > { %795 = vmatpush2.bf16.msra.mxu0 %v2135_v58  ;;  %v2245_v58 = vld [vmem:[#allocation11 + $0x1e0] ss:$16 sps:$4 sm:$0xff]  }
  0xbb   : > { %836 = vmatpush2.bf16.msra.mxu1 %v2136_v59  ;;  %796 = vmatprep.subr.bf16.mxu0 %v2137_v60  ;;  %v2253_v59 = vld [vmem:[#allocation11 + $0x1c4] ss:$16 sps:$4 sm:$0xff]   ;;  %v2251_v60 = vld [vmem:[#allocation11 + $0x1c0] ss:$16 sps:$4 sm:$0xff]  }
  0xbc   : > { %837 = vmatprep.subr.bf16.mxu1 %v2139_v61  ;;  %v2259_v61 = vld [vmem:[#allocation11 + $0x1a4] ss:$16 sps:$4 sm:$0xff]  }
  0xbe   : > { %797 = vmatpush2.bf16.msra.mxu0 %v2141_v62  ;;  %v2257_v62 = vld [vmem:[#allocation11 + $0x1a0] ss:$16 sps:$4 sm:$0xff]  }
  0xbf   : > { %838 = vmatpush2.bf16.msra.mxu1 %v2142_v63  ;;  %798 = vmatprep.subr.bf16.mxu0 %v2143_v0  ;;  %v2265_v63 = vld [vmem:[#allocation11 + $0x184] ss:$16 sps:$4 sm:$0xff]   ;;  %v2263_v0 = vld [vmem:[#allocation11 + $0x180] ss:$16 sps:$4 sm:$0xff]  }
  0xc0   : > { %839 = vmatprep.subr.bf16.mxu1 %v2145_v1  ;;  %v2271_v1 = vld [vmem:[#allocation11 + $0x164] ss:$16 sps:$4 sm:$0xff]  }
  0xc2   : > { %799 = vmatpush2.bf16.msra.mxu0 %v2147_v2  ;;  %v2269_v2 = vld [vmem:[#allocation11 + $0x160] ss:$16 sps:$4 sm:$0xff]  }
  0xc3   : > { %840 = vmatpush2.bf16.msra.mxu1 %v2148_v3  ;;  %1058 = vmatprep.subr.bf16.mxu0 %v2151_v6  ;;  %v2277_v3 = vld [vmem:[#allocation11 + $0x144] ss:$16 sps:$4 sm:$0xff]   ;;  %v2775_v6 = vshrl.u32 %v438_v5, 7 }
  0xc4   : > { %1509 = vmatprep.subr.bf16.mxu1 %v2199_v41  ;;  %v2244_v41 = vld [vmem:[#allocation11 + $0xc] ss:$16 sps:$4 sm:$0xff]  }
  0xc5   : > { %801 = vmatmul.mubr.bf16.vlgmr.msra.gmra.mxu0 %v368_v8  ;;  %v436_v8 = vld [vmem:[#allocation7] sm:$0x3] }
  0xc6   : > { %842 = vmatmul.mubr.bf16.vlgmr.msra.gmra.mxu1 %v370_v9  ;;  %1059 = vmatpush1.bf16.msra.mxu0 %v2149_v7  ;;  %v2778_v7 = vsub.s32 0, %v2775_v6  ;;  %v2781_v9 = vsub.s32 1, %v2775_v6 }
  0xc7   : > { %1060 = vmatprep.subr.bf16.mxu0 %v2154_v10  ;;  %1510 = vmatpush1.bf16.msra.mxu1 %v2197_v40  ;;  %v2236_v40 = vld [vmem:[#allocation11 + $0x28] ss:$16 sps:$4 sm:$0xff]  }
  0xc8   : > { %1511 = vmatprep.subr.bf16.mxu1 %v2205_v43  ;;  %v441_v10 = vrot.slane %v436_v8, %v2778_v7  ;;  %v2250_v43 = vld [vmem:[#allocation11 + $0x1ec] ss:$16 sps:$4 sm:$0xff]  }
  0xca   : > { %1061 = vmatpush1.bf16.msra.mxu0 %v2152_v11  ;;  %v445_v11 = vrot.slane %v436_v8, %v2781_v9 }
  0xcb   : > { %1062 = vmatprep.subr.bf16.mxu0 %v2157_v12  ;;  %1512 = vmatpush1.bf16.msra.mxu1 %v2203_v44  ;;  %v2248_v44 = vld [vmem:[#allocation11 + $0x1e8] ss:$16 sps:$4 sm:$0xff]  }
  0xcc   : > { %1513 = vmatprep.subr.bf16.mxu1 %v2211_v45  ;;  %v2256_v45 = vld [vmem:[#allocation11 + $0x1cc] ss:$16 sps:$4 sm:$0xff]  }
  0xce   : > { %1063 = vmatpush1.bf16.msra.mxu0 %v2155_v13 }
  0xcf   : > { %1064 = vmatprep.subr.bf16.mxu0 %v2160_v14  ;;  %1514 = vmatpush1.bf16.msra.mxu1 %v2209_v46  ;;  %v2254_v46 = vld [vmem:[#allocation11 + $0x1c8] ss:$16 sps:$4 sm:$0xff]  }
  0xd0   : > { %1515 = vmatprep.subr.bf16.mxu1 %v2217_v47  ;;  %v2262_v47 = vld [vmem:[#allocation11 + $0x1ac] ss:$16 sps:$4 sm:$0xff]  }
  0xd2   : > { %1065 = vmatpush1.bf16.msra.mxu0 %v2158_v15 }
  0xd3   : > { %1066 = vmatprep.subr.bf16.mxu0 %v2163_v16  ;;  %1516 = vmatpush1.bf16.msra.mxu1 %v2215_v48  ;;  %v2260_v48 = vld [vmem:[#allocation11 + $0x1a8] ss:$16 sps:$4 sm:$0xff]  }
  0xd4   : > { %1517 = vmatprep.subr.bf16.mxu1 %v2223_v49  ;;  %v2268_v49 = vld [vmem:[#allocation11 + $0x18c] ss:$16 sps:$4 sm:$0xff]  }
  0xd6   : > { %1067 = vmatpush1.bf16.msra.mxu0 %v2161_v17 }
  0xd7   : > { %1068 = vmatprep.subr.bf16.mxu0 %v2166_v18  ;;  %1518 = vmatpush1.bf16.msra.mxu1 %v2221_v50  ;;  %v2266_v50 = vld [vmem:[#allocation11 + $0x188] ss:$16 sps:$4 sm:$0xff]  }
  0xd8   : > { %1519 = vmatprep.subr.bf16.mxu1 %v2229_v51  ;;  %v2274_v51 = vld [vmem:[#allocation11 + $0x16c] ss:$16 sps:$4 sm:$0xff]  }
  0xda   : > { %1069 = vmatpush1.bf16.msra.mxu0 %v2164_v19 }
  0xdb   : > { %1070 = vmatprep.subr.bf16.mxu0 %v2169_v20  ;;  %1520 = vmatpush1.bf16.msra.mxu1 %v2227_v52  ;;  %v2272_v52 = vld [vmem:[#allocation11 + $0x168] ss:$16 sps:$4 sm:$0xff]  }
  0xdc   : > { %1521 = vmatprep.subr.bf16.mxu1 %v2235_v53  ;;  %v2280_v53 = vld [vmem:[#allocation11 + $0x14c] ss:$16 sps:$4 sm:$0xff]  }
  0xde   : > { %1071 = vmatpush1.bf16.msra.mxu0 %v2167_v21 }
  0xdf   : > { %1072 = vmatprep.subr.bf16.mxu0 %v2172_v22  ;;  %1522 = vmatpush1.bf16.msra.mxu1 %v2233_v54  ;;  %v2278_v54 = vld [vmem:[#allocation11 + $0x148] ss:$16 sps:$4 sm:$0xff]  }
  0xe0   : > { %1523 = vmatprep.subr.bf16.mxu1 %v2241_v55  ;;  %v2283_v55 = vld [vmem:[#allocation11 + $0x124] ss:$16 sps:$4 sm:$0xff]  }
  0xe2   : > { %1073 = vmatpush1.bf16.msra.mxu0 %v2170_v23 }
  0xe3   : > { %1074 = vmatprep.subr.bf16.mxu0 %v2175_v24  ;;  %1524 = vmatpush1.bf16.msra.mxu1 %v2239_v56  ;;  %v2286_v56 = vld [vmem:[#allocation11 + $0x12c] ss:$16 sps:$4 sm:$0xff]  }
  0xe4   : > { %1525 = vmatprep.subr.bf16.mxu1 %v2247_v57  ;;  %v2281_v57 = vld [vmem:[#allocation11 + $0x120] ss:$16 sps:$4 sm:$0xff]  }
  0xe6   : > { %1075 = vmatpush2.bf16.msra.mxu0 %v2173_v25 }
  0xe7   : > { %1076 = vmatprep.subr.bf16.mxu0 %v2178_v26  ;;  %1526 = vmatpush2.bf16.msra.mxu1 %v2245_v58  ;;  %v2284_v58 = vld [vmem:[#allocation11 + $0x128] ss:$16 sps:$4 sm:$0xff]  }
  0xe8   : > { %1527 = vmatprep.subr.bf16.mxu1 %v2253_v59  ;;  %v2289_v59 = vld [vmem:[#allocation11 + $0x104] ss:$16 sps:$4 sm:$0xff]  }
  0xea   : > { %1077 = vmatpush2.bf16.msra.mxu0 %v2176_v27  ;;  %v2200_v27 = vld [vmem:[#allocation11 + $0xe8] ss:$16 sps:$4 sm:$0xff]  }
  0xeb   : > { %1078 = vmatprep.subr.bf16.mxu0 %v2181_v28  ;;  %1528 = vmatpush2.bf16.msra.mxu1 %v2251_v60  ;;  %v2292_v60 = vld [vmem:[#allocation11 + $0x10c] ss:$16 sps:$4 sm:$0xff]  }
  0xec   : > { %1529 = vmatprep.subr.bf16.mxu1 %v2259_v61  ;;  %v2287_v61 = vld [vmem:[#allocation11 + $0x100] ss:$16 sps:$4 sm:$0xff]  }
  0xee   : > { %1079 = vmatpush2.bf16.msra.mxu0 %v2179_v29  ;;  %v2208_v29 = vld [vmem:[#allocation11 + $0xcc] ss:$16 sps:$4 sm:$0xff]  }
  0xef   : > { %1080 = vmatprep.subr.bf16.mxu0 %v2184_v30  ;;  %1530 = vmatpush2.bf16.msra.mxu1 %v2257_v62  ;;  %v2206_v30 = vld [vmem:[#allocation11 + $0xc8] ss:$16 sps:$4 sm:$0xff]  }
  0xf0   : > { %1531 = vmatprep.subr.bf16.mxu1 %v2265_v63  ;;  %v2290_v62 = vld [vmem:[#allocation11 + $0x108] ss:$16 sps:$4 sm:$0xff]   ;;  %v886_v63 = vld [vmem:[#allocation10] sm:$0x3] }
  0xf2   : > { %1081 = vmatpush2.bf16.msra.mxu0 %v2182_v31  ;;  %v2214_v31 = vld [vmem:[#allocation11 + $0xac] ss:$16 sps:$4 sm:$0xff]  }
  0xf3   : > { %1082 = vmatprep.subr.bf16.mxu0 %v2187_v32  ;;  %1532 = vmatpush2.bf16.msra.mxu1 %v2263_v0  ;;  %v2212_v32 = vld [vmem:[#allocation11 + $0xa8] ss:$16 sps:$4 sm:$0xff]   ;;  %v891_v0 = vrot.slane %v886_v63, %v2778_v7 }
  0xf4   : > { %1533 = vmatprep.subr.bf16.mxu1 %v2271_v1  ;;  %v895_v1 = vrot.slane %v886_v63, %v2781_v9 }
  0xf6   : > { %1083 = vmatpush2.bf16.msra.mxu0 %v2185_v33  ;;  %v2220_v33 = vld [vmem:[#allocation11 + $0x8c] ss:$16 sps:$4 sm:$0xff]  }
  0xf7   : > { %1084 = vmatprep.subr.bf16.mxu0 %v2190_v34  ;;  %1534 = vmatpush2.bf16.msra.mxu1 %v2269_v2  ;;  %v2218_v34 = vld [vmem:[#allocation11 + $0x88] ss:$16 sps:$4 sm:$0xff]  }
  0xf8   : > { %1535 = vmatprep.subr.bf16.mxu1 %v2277_v3 }
  0xfa   : > { %1085 = vmatpush2.bf16.msra.mxu0 %v2188_v35  ;;  %v2226_v35 = vld [vmem:[#allocation11 + $0x6c] ss:$16 sps:$4 sm:$0xff]  }
  0xfb   : > { %1086 = vmatprep.subr.bf16.mxu0 %v2193_v36  ;;  %1536 = vmatpush2.bf16.msra.mxu1 %v2275_v4  ;;  %v2224_v36 = vld [vmem:[#allocation11 + $0x68] ss:$16 sps:$4 sm:$0xff]  }
  0xfc   : > { %1537 = vmatprep.subr.bf16.mxu1 %v2283_v55 }
  0xfe   : > { %1087 = vmatpush2.bf16.msra.mxu0 %v2191_v37  ;;  %v2232_v37 = vld [vmem:[#allocation11 + $0x4c] ss:$16 sps:$4 sm:$0xff]  }
  0xff   : > { %1088 = vmatprep.subr.bf16.mxu0 %v2196_v38  ;;  %v2230_v38 = vld [vmem:[#allocation11 + $0x48] ss:$16 sps:$4 sm:$0xff]   ;;  %1538 = vmatpush2.bf16.msra.mxu1 %v2281_v57 }
 0x100   : > { %1539 = vmatprep.subr.bf16.mxu1 %v2289_v59 }
 0x102   : > { %1089 = vmatpush2.bf16.msra.mxu0 %v2194_v39  ;;  %v2238_v39 = vld [vmem:[#allocation11 + $0x2c] ss:$16 sps:$4 sm:$0xff]  }
 0x103   : > { %1550 = vmatprep.subr.bf16.mxu0 %v2202_v42  ;;  %v2242_v42 = vld [vmem:[#allocation11 + $0x8] ss:$16 sps:$4 sm:$0xff]   ;;  %1540 = vmatpush2.bf16.msra.mxu1 %v2287_v61 }
 0x185   : > { %v802_v12 = vpop.f32.mrf.mxu0 }
 0x186   : > { %v843_v13 = vpop.f32.mrf.mxu1  ;;  %v803_v14 = vadd.f32 %v802_v12, %v441_v10 }
 0x187   : > { %v804_v15 = vpop.f32.mrf.mxu0 }
 0x188   : > { %v845_v16 = vpop.f32.mrf.mxu1  ;;  %v844_v17 = vadd.f32 %v843_v13, %v803_v14  ;;  %v805_v18 = vadd.f32 %v804_v15, %v445_v11  ;;  %v1179_v15 = vsub.s32 2, %v2775_v6 }
 0x189   : > { %v806_v19 = vpop.f32.mrf.mxu0 }
 0x18a   : > { %v847_v20 = vpop.f32.mrf.mxu1  ;;  %v846_v21 = vadd.f32 %v845_v16, %v805_v18  ;;  %v850_v22 = vmax.f32 %v844_v17, 0.0  ;;  %v1167_v16 = vld [vmem:[%s2842_s6] sm:$0xf]  ;;  %v1183_v17 = vsub.s32 3, %v2775_v6 }
 0x18b   : > { %v807_v23 = vpop.f32.mrf.mxu0  ;;  %v1172_v18 = vrot.slane %v1167_v16, %v2778_v7  ;;  %v1180_v19 = vrot.slane %v1167_v16, %v1179_v15  ;;  %v1176_v20 = vrot.slane %v1167_v16, %v2781_v9 }
 0x18c   : > { %v848_v24 = vpop.f32.mrf.mxu1  ;;  %v851_v25 = vmax.f32 %v846_v21, 0.0  ;;  %v852_v28 = vpack.c.bf16 %v850_v22, %v850_v22  ;;  %v1184_v21 = vrot.slane %v1167_v16, %v1183_v17 }
 0x18e   : > { %v853_v26 = vpack.c.bf16 %v851_v25, %v851_v25 }
 0x190   : > { %1090 = vmatprep.mubr.bf16.mxu0 %v853_v26 }
 0x191   : > { %1091 = vmatmul.mubr.bf16.vlgmr.msra.gmra.mxu0 %v852_v28 }
 0x192   : > { %1551 = vmatpush1.bf16.msra.mxu0 %v2200_v27 }
 0x193   : > { %1552 = vmatprep.subr.bf16.mxu0 %v2208_v29 }
 0x196   : > { %1553 = vmatpush1.bf16.msra.mxu0 %v2206_v30 }
 0x197   : > { %1554 = vmatprep.subr.bf16.mxu0 %v2214_v31 }
 0x19a   : > { %1555 = vmatpush1.bf16.msra.mxu0 %v2212_v32 }
 0x19b   : > { %1556 = vmatprep.subr.bf16.mxu0 %v2220_v33 }
 0x19e   : > { %1557 = vmatpush1.bf16.msra.mxu0 %v2218_v34 }
 0x19f   : > { %1558 = vmatprep.subr.bf16.mxu0 %v2226_v35 }
 0x1a2   : > { %1559 = vmatpush1.bf16.msra.mxu0 %v2224_v36 }
 0x1a3   : > { %1560 = vmatprep.subr.bf16.mxu0 %v2232_v37 }
 0x1a6   : > { %1561 = vmatpush1.bf16.msra.mxu0 %v2230_v38 }
 0x1a7   : > { %1562 = vmatprep.subr.bf16.mxu0 %v2238_v39 }
 0x1aa   : > { %1563 = vmatpush1.bf16.msra.mxu0 %v2236_v40 }
 0x1ab   : > { %1564 = vmatprep.subr.bf16.mxu0 %v2244_v41 }
 0x1ae   : > { %1565 = vmatpush1.bf16.msra.mxu0 %v2242_v42 }
 0x1af   : > { %1566 = vmatprep.subr.bf16.mxu0 %v2250_v43 }
 0x1b2   : > { %1567 = vmatpush2.bf16.msra.mxu0 %v2248_v44 }
 0x1b3   : > { %1568 = vmatprep.subr.bf16.mxu0 %v2256_v45 }
 0x1b6   : > { %1569 = vmatpush2.bf16.msra.mxu0 %v2254_v46 }
 0x1b7   : > { %1570 = vmatprep.subr.bf16.mxu0 %v2262_v47 }
 0x1ba   : > { %1571 = vmatpush2.bf16.msra.mxu0 %v2260_v48 }
 0x1bb   : > { %1572 = vmatprep.subr.bf16.mxu0 %v2268_v49 }
 0x1be   : > { %1573 = vmatpush2.bf16.msra.mxu0 %v2266_v50 }
 0x1bf   : > { %1574 = vmatprep.subr.bf16.mxu0 %v2274_v51 }
 0x1c2   : > { %1575 = vmatpush2.bf16.msra.mxu0 %v2272_v52 }
 0x1c3   : > { %1576 = vmatprep.subr.bf16.mxu0 %v2280_v53 }
 0x1c6   : > { %1577 = vmatpush2.bf16.msra.mxu0 %v2278_v54 }
 0x1c7   : > { %1578 = vmatprep.subr.bf16.mxu0 %v2286_v56 }
 0x1ca   : > { %1579 = vmatpush2.bf16.msra.mxu0 %v2284_v58 }
 0x1cb   : > { %1580 = vmatprep.subr.bf16.mxu0 %v2292_v60 }
 0x1ce   : > { %1581 = vmatpush2.bf16.msra.mxu0 %v2290_v62 }
 0x251   : > { %v1092_v2 = vpop.f32.mrf.mxu0 }
 0x252   : > { %v1093_v3 = vadd.f32 %v1092_v2, %v891_v0 }
 0x253   : > { %v1094_v4 = vpop.f32.mrf.mxu0 }
 0x254   : > { %v1095_v5 = vadd.f32 %v1094_v4, %v895_v1  ;;  %v1099_v8 = vmax.f32 %v1093_v3, 0.0 }
 0x255   : > { %v1096_v10 = vpop.f32.mrf.mxu0 }
 0x256   : > { %v1100_v11 = vmax.f32 %v1095_v5, 0.0  ;;  %v1101_v14 = vpack.c.bf16 %v1099_v8, %v1099_v8 }
 0x257   : > { %v1097_v12 = vpop.f32.mrf.mxu0 }
 0x258   : > { %v1102_v13 = vpack.c.bf16 %v1100_v11, %v1100_v11 }
 0x25a   : > { %1541 = vmatprep.mubr.bf16.mxu1 %v1102_v13  ;;  %1582 = vmatprep.mubr.bf16.mxu0 %v1102_v13 }
 0x25b   : > { %1542 = vmatmul.mubr.bf16.vlgmr.msra.gmra.mxu1 %v1101_v14  ;;  %1583 = vmatmul.mubr.bf16.vlgmr.msra.gmra.mxu0 %v1101_v14 }
 0x31b   : > { %v1543_v22 = vpop.f32.mrf.mxu1  ;;  %v1584_v23 = vpop.f32.mrf.mxu0 }
 0x31c   : > { %v1544_v24 = vadd.f32 %v1543_v22, %v1172_v18  ;;  %v1585_v25 = vadd.f32 %v1584_v23, %v1180_v19 }
 0x31d   : > { %v1545_v26 = vpop.f32.mrf.mxu1  ;;  %v1586_v27 = vpop.f32.mrf.mxu0 }
 0x31e   : > { %v1591_v28 = vsub.f32 0.0, %v1544_v24  ;;  %v1593_v29 = vsub.f32 0.0, %v1585_v25  ;;  %v1546_v30 = vadd.f32 %v1545_v26, %v1176_v20  ;;  %v1587_v31 = vadd.f32 %v1586_v27, %v1184_v21 }
 0x31f   : > { %v1547_v32 = vpop.f32.mrf.mxu1  ;;  %v1588_v33 = vpop.f32.mrf.mxu0 }
 0x320   : > { %v1595_v34 = vmul.f32 1.442695, %v1591_v28  ;;  %v1599_v6 = vmul.f32 1.442695, %v1593_v29  ;;  %v1592_v35 = vsub.f32 0.0, %v1546_v30  ;;  %v1594_v7 = vsub.f32 0.0, %v1587_v31 }
 0x321   : > { %v1548_v36 = vpop.f32.mrf.mxu1  ;;  %v1589_v37 = vpop.f32.mrf.mxu0 }
 0x322   : > { %2293 = vpow2.f32 %v1595_v34  ;;  %v1597_v9 = vmul.f32 1.442695, %v1592_v35  ;;  %v1601_v38 = vmul.f32 1.442695, %v1594_v7 }
 0x323   : > { %2295 = vpow2.f32 %v1599_v6 }
 0x324   : > { %2297 = vpow2.f32 %v1597_v9 }
 0x325   : > { %2299 = vpow2.f32 %v1601_v38 }
 0x32f   : > { %v2294_v39 = vpop.eup %2293 }
 0x330   : > { %v2296_v40 = vpop.eup %2295  ;;  %v1603_v41 = vadd.f32 1.0, %v2294_v39 }
 0x331   : > { %v2298_v42 = vpop.eup %2297  ;;  %v1605_v43 = vadd.f32 1.0, %v2296_v40 }
 0x332   : > { %v2300_v44 = vpop.eup %2299  ;;  %2301 = vrcp.f32 %v1603_v41  ;;  %v1604_v45 = vadd.f32 1.0, %v2298_v42 }
 0x333   : > { %2303 = vrcp.f32 %v1605_v43  ;;  %v1606_v46 = vadd.f32 1.0, %v2300_v44 }
 0x334   : > { %2305 = vrcp.f32 %v1604_v45 }
 0x335   : > { %2307 = vrcp.f32 %v1606_v46 }
 0x33f   : > { %v2302_v47 = vpop.eup %2301 }
 0x340   : > { %v2304_v48 = vpop.eup %2303 }
 0x341   : > { %v2306_v49 = vpop.eup %2305 }
 0x342   : > { %v2308_v50 = vpop.eup %2307  ;;  %v1949_v51 = vpack.c.bf16 %v2306_v49, %v2302_v47 }
 0x343   : > { %v1950_v52 = vpack.c.bf16 %v2308_v50, %v2304_v48 }
 0x344   : > { %1627 = vst [vmem:[%s363_s20] sm:$0xff] %v1949_v51 }
 0x345   : > { %1628 = vst [vmem:[%s363_s20 + $0x8] sm:$0xff] %v1950_v52 }
 0x346   : > { %2480 = shalt.err (!%p2477_p1)
}
 0x347   : > { %s2481_s17 = scalar_lea.hbm %s2799_s13, 256  ;;  %s2485_s2 = scalar_lea.hbm %s2843_s7, 512 }
 0x348   : > { %p2482_p5 = scmp.ne.s32.totalorder %s2799_s13, %s2481_s17  ;;  %p2486_p11 = scmp.lt.s32.totalorder %s2799_s13, %s2843_s7 }
 0x349   : > { %p2487_p7 = scmp.lt.s32.totalorder %s2485_s2, %s2481_s17 }
 0x34a   : > { %p2483_p6 = pnand %p2482_p5, %p2868_p2 }
 0x34b   : > { %p2488_p13 = por %p2487_p7, %p2486_p11 }
 0x34c   : > { %p2484_p10 = pneg %p2483_p6 }
 0x34e   : > { %p2489_p0 = pnand %p2488_p13, %p2484_p10 }
 0x350   : > { %2492 = shalt.err (!%p2489_p0)
}
 0x351   : > { %1974 = dma.vmem_to_hbm [thread:$0]  (%p2868_p2), %s1645_s21, 256, %s2799_s13, %s1630_s16  }
 0x352 PF: > { %s1656_s19 = sand.u32 1, %s2531_s24   ;;  %p2869_p8 = scmp.ne.s32.totalorder %s2858_s15, 0 }
 0x353   : > { %p2870_p9 = scmp.ge.s32.totalorder %s2543_s27, 2  ;;  %s1657_s20 = scalar_lea.sflag [#allocation4], %s1656_s19 }
 0x355   : > { %p1997_p12 = pnand %p2870_p9, %p2869_p8 }
 0x357   : > { %p1998_p3 = pneg %p1997_p12 }
 0x359   : > { %2526 = dma.done.wait (%p1998_p3), %s1657_s20, 256  }
 0x35a   : > { %2528 = vsyncadd (%p1998_p3), %s1657_s20, 4294967040  ;;  %p23_p4 = scmp.ge.s32.totalorder %s2692_s23, 4   ;;  %s2871_s24 = smov %s2535_s25 }
 0x35b   : > { %s2872_s25 = smov %s2539_s26  ;;  %s2873_s26 = smov %s2704_s9 }
 0x35c   : > { %s2874_s27 = smov %s2692_s23  ;;  %25 = sbr.rel (!%p23_p4) target bundleno = 11 (0xb), region = 113 }
 0x361   :  { %1662 = vsyncpa [#allocation3], 1 }
 0x362   :  { %1664 = vsyncpa [#allocation3 + $0x1], 1 }
 0x363   :  { %1665 = vsyncpa [#allocation6], 1 }
 0x364   :  { %1666 = vsyncpa [#allocation9], 1 }
 0x365   :  { %1667 = vsyncpa [#allocation12], 1 }
 0x366   :  { %1668 = vsyncpa [#allocation4], 1 }
 0x367   :  { %1670 = vsyncpa [#allocation4 + $0x1], 1 }

</bundles_post_ra>
